<compile_context>
chip_gen: v7x
topology: tpu7x:2x2x1
jax: 0.10.0
libtpu: 0.0.40
codegen_flags: <defaults>
</compile_context>

<pallas_src>
import jax
import jax.numpy as jnp
from jax.experimental import pallas as pl
from jax.experimental.pallas import tpu as pltpu

GN_EPS = 1e-5  # torch.nn.GroupNorm default eps


def sa_kernel(params_ref, x_ref, o_ref):
    # x_ref      : (K2, BQ, CG, HW)  input block; row r = s*half + m
    #              (K2 == 2 when the channel shuffle is fused into the output)
    # o_ref      : (BQ, CG, K2*HW)   shuffled layout: lane block k holds the
    #                                k-th half of the groups
    # params_ref : (3, CG, 1) f32    per-row [alpha, beta, gamma]:
    #    channel rows (r <  half): alpha = 0,          beta = c_w, gamma = c_b
    #    spatial rows (r >= half): alpha = s_w*gn_w,   beta = 0,   gamma = s_w*gn_b + s_b
    # Both branches share one form:  out = x * sigmoid(x*GA + GB)
    #    GA = alpha * rsqrt(var + eps),  GB = (beta - GA) * mean + gamma
    k2, bq, cg, hw = x_ref.shape

    alpha = params_ref[0]          # (CG, 1) f32, resident across the whole grid
    beta = params_ref[1]
    gamma = params_ref[2]

    xin = x_ref[...]               # single block load in the I/O dtype

    # One-pass f32 statistics over the spatial axis (no centered-difference
    # temporaries; upcasts folded into the reductions so Mosaic streams them).
    inv_hw = jnp.float32(1.0 / hw)
    s1 = jnp.sum(xin, axis=-1, keepdims=True, dtype=jnp.float32)
    s2 = jnp.sum(xin * xin, axis=-1, keepdims=True, dtype=jnp.float32)
    mean = s1 * inv_hw                                       # (K2,BQ,CG,1) f32
    var = jnp.maximum(s2 * inv_hw - mean * mean, 0.0)        # clamp E[x^2]-E[x]^2
    rstd = jax.lax.rsqrt(var + GN_EPS)

    ga = alpha * rstd              # exactly 0 on channel-branch rows
    gb = (beta - ga) * mean + gamma

    # Big elementwise math: xin promotes to f32 against ga/gb (streamed cast).
    # f32 keeps v5e off bf16 emulation and the folded affine precise; the VPU/EUP
    # have slack because the kernel is HBM-bandwidth bound.
    gate = jax.nn.sigmoid(xin * ga + gb)
    res = (xin * gate).astype(o_ref.dtype)                   # (K2,BQ,CG,HW)

    # Full-sublane (CG rows), lane-aligned stores: hw % 128 == 0 whenever k2 == 2
    # (fused-shuffle path); k2 == 1 writes the whole buffer in one store.
    for k in range(k2):                                      # K2 in {1,2}: static unroll
        o_ref[:, :, k * hw:(k + 1) * hw] = res[k]


def _vmem_capacity_bytes():
    try:
        return int(pltpu.get_tpu_info().vmem_capacity_bytes)
    except Exception:
        return 64 * 1024 * 1024    # conservative default: v7x per-TensorCore VMEM


def sa_module_pallas(x, params, groups):
    """x: (b, c, h, w) NCHW, f32 or bf16.  params: (6, half, 1) stacked
       [c_weight, c_bias, s_weight, s_bias, gn_weight, gn_bias]."""
    b, c, h, w = x.shape
    if c % (2 * groups) != 0:
        raise ValueError("channels must be divisible by 2*groups")
    half = c // (2 * groups)
    cg = 2 * half
    hw = h * w
    itemsize = jnp.dtype(x.dtype).itemsize

    # Fused channel_shuffle(2): group g pairs with group g + groups//2; their
    # shuffled output channels form one contiguous HBM block.  Only taken when
    # lane-dense (the k=1 store lands at lane offset hw, so require hw % 128 == 0).
    fuse_shuffle = (groups % 2 == 0) and (hw % 128 == 0)
    k2 = 2 if fuse_shuffle else 1
    gg = groups // k2              # groups handled per k-half

    # ---- per-row gate parameters (tiny; folded once outside the kernel) ----
    c_w, c_b, s_w, s_b, gn_w, gn_b = [
        params[i].reshape(half).astype(jnp.float32) for i in range(6)
    ]
    alpha = jnp.concatenate([jnp.zeros_like(c_w), s_w * gn_w])
    beta = jnp.concatenate([c_w, jnp.zeros_like(c_w)])
    gamma = jnp.concatenate([c_b, s_w * gn_b + s_b])
    row_params = jnp.stack([alpha, beta, gamma]).reshape(3, cg, 1)

    # ---- block sizing against a per-generation VMEM budget ----
    # Per block element: 2x input + 2x output double buffers + ~4 f32 temporaries.
    vmem_cap = _vmem_capacity_bytes()
    vmem_limit = min(3 * vmem_cap // 4, 96 * 1024 * 1024)    # 48 MiB v7x, 96 MiB v5e/v6e
    per_elem_bytes = 4 * itemsize + 16
    max_block_elems = max((2 * vmem_limit // 3) // per_elem_bytes, 1)

    def block_elems(d):
        return k2 * d * cg * hw

    def n_steps(d):
        return b * (gg // d)

    divisors = [d for d in range(1, gg + 1) if gg % d == 0]
    fitting = [d for d in divisors if block_elems(d) <= max_block_elems] or [1]
    # Prefer an even number of grid steps (ideally >= 4) so v7x's two
    # TensorCores stay balanced; costs nothing on single-TC chips.
    preferred = [d for d in fitting if n_steps(d) % 2 == 0 and n_steps(d) >= 4]
    at_least_two = [d for d in fitting if n_steps(d) >= 2]
    bq = max(preferred or at_least_two or fitting)
    nj = gg // bq

    # channel = (k*gg + jg)*cg + r  ->  free view, no HBM movement
    xr = x.reshape(b * k2, gg, cg, hw)

    out = pl.pallas_call(
        sa_kernel,
        out_shape=jax.ShapeDtypeStruct((b * gg, cg, k2 * hw), x.dtype),
        grid_spec=pltpu.PrefetchScalarGridSpec(
            num_scalar_prefetch=0,
            grid=(b, nj),
            in_specs=[
                # params: constant index_map -> DMA'd once, kept resident
                pl.BlockSpec((3, cg, 1), lambda bi, jb: (0, 0, 0)),
                # both k-halves of batch bi, `bq` groups per half
                pl.BlockSpec((k2, bq, cg, hw), lambda bi, jb: (bi, jb, 0, 0)),
            ],
            # shuffled output: row r = s*half + m, lane block k*hw + p
            out_specs=pl.BlockSpec((bq, cg, k2 * hw),
                                   lambda bi, jb: (bi * nj + jb, 0, 0)),
        ),
        compiler_params=pltpu.CompilerParams(
            dimension_semantics=("parallel", "parallel"),
            vmem_limit_bytes=int(vmem_limit),
        ),
    )(row_params, xr)

    if k2 == 2:
        # channel_shuffle(2) already fused into the output layout:
        # flattening (b, gg*cg, 2*hw) row-major gives channel = 2*j + k.
        return out.reshape(b, c, h, w)

    # TODO(synk): non-fusable cases (odd groups or hw % 128 != 0) do
    # channel_shuffle(2) as a plain-JAX epilogue (one extra HBM pass).
    pre = out.reshape(b, c, h, w)
    return pre.reshape(b, 2, c // 2, h, w).transpose(0, 2, 1, 3, 4).reshape(b, c, h, w)


def sa_module_reference(x, params, groups):
    """Pure-JAX reference matching the PyTorch forward exactly (f32)."""
    b, c, h, w = x.shape
    half = c // (2 * groups)
    c_w, c_b, s_w, s_b, gn_w, gn_b = [
        params[i].reshape(1, half, 1, 1) for i in range(6)
    ]
    xr = x.reshape(b * groups, 2 * half, h, w)
    x0, x1 = xr[:, :half], xr[:, half:]

    xn_pool = x0.mean(axis=(2, 3), keepdims=True)
    xn = x0 * jax.nn.sigmoid(c_w * xn_pool + c_b)

    mean1 = x1.mean(axis=(2, 3), keepdims=True)
    var1 = ((x1 - mean1) ** 2).mean(axis=(2, 3), keepdims=True)
    x1n = (x1 - mean1) / jnp.sqrt(var1 + GN_EPS) * gn_w + gn_b
    xs = x1 * jax.nn.sigmoid(s_w * x1n + s_b)

    out = jnp.concatenate([xn, xs], axis=1).reshape(b, c, h, w)
    out = out.reshape(b, 2, c // 2, h, w).transpose(0, 2, 1, 3, 4).reshape(b, c, h, w)
    return out


if __name__ == "__main__":
    def run_case(b, c, h, w, groups, dtype=jnp.float32, tol=1e-4):
        half = c // (2 * groups)
        key = jax.random.PRNGKey(0)
        kx, kp = jax.random.split(key)
        x = jax.random.normal(kx, (b, c, h, w), dtype=jnp.float32).astype(dtype)

        # Module defaults (c_w=0, c_b=1, s_w=0, s_b=1, gn_w=1, gn_b=0),
        # perturbed so every term of the computation is exercised.
        base = jnp.stack([
            jnp.zeros((half,)), jnp.ones((half,)),   # c_weight, c_bias
            jnp.zeros((half,)), jnp.ones((half,)),   # s_weight, s_bias
            jnp.ones((half,)), jnp.zeros((half,)),   # gn.weight, gn.bias
        ])
        params = (base + 0.1 * jax.random.normal(kp, base.shape))
        params = params.reshape(6, half, 1).astype(jnp.float32)

        out = jax.block_until_ready(sa_module_pallas(x, params, groups))
        ref = sa_module_reference(x.astype(jnp.float32), params, groups)
        assert out.shape == (b, c, h, w)
        assert jnp.allclose(out.astype(jnp.float32), ref, atol=tol, rtol=tol), (
            f"mismatch (groups={groups}, hw={h * w}, dtype={dtype})")

    run_case(2, 16, 16, 16, groups=4)                                 # fused shuffle (hw=256)
    run_case(2, 16, 8, 8, groups=4)                                   # hw%128!=0 -> unfused path
    run_case(2, 16, 8, 8, groups=1)                                   # odd groups -> unfused path
    run_case(2, 32, 16, 16, groups=4, dtype=jnp.bfloat16, tol=3e-2)   # bf16 I/O (halves HBM bytes)
    print("KERNEL_OK")
</pallas_src>

<mosaic_0001>
module attributes {stable_mosaic.version = 11 : i64} {
  func.func @sa_kernel(%arg0: i32, %arg1: i32, %arg2: memref<3x4x1xf32, #tpu.memory_space<vmem>>, %arg3: memref<2x1x4x256xf32, #tpu.memory_space<vmem>>, %arg4: memref<1x4x512xf32, #tpu.memory_space<vmem>>) attributes {dimension_semantics = [#tpu.dimension_semantics<parallel>, #tpu.dimension_semantics<parallel>], iteration_bounds = array<i64: 2, 2>, scalar_prefetch = 0 : i64, scratch_operands = 0 : i64, tpu.core_type = #tpu.core_type<tc>, window_params = [{pipeline_mode = #tpu.pipeline_mode<synchronous>, transform_indices = @transform_0, window_bounds = array<i64: 3, 4, 1>}, {transform_indices = @transform_1, window_bounds = array<i64: 2, 1, 4, 256>}, {transform_indices = @transform_2, window_bounds = array<i64: 1, 4, 512>}]} {
    %c0 = arith.constant 0 : index
    %c0_0 = arith.constant 0 : index
    %c0_1 = arith.constant 0 : index
    %0 = vector.load %arg2[%c0, %c0_0, %c0_1] : memref<3x4x1xf32, #tpu.memory_space<vmem>>, vector<1x4x1xf32>
    %1 = vector.shape_cast %0 : vector<1x4x1xf32> to vector<4x1xf32>
    %c1 = arith.constant 1 : index
    %c0_2 = arith.constant 0 : index
    %c0_3 = arith.constant 0 : index
    %2 = vector.load %arg2[%c1, %c0_2, %c0_3] : memref<3x4x1xf32, #tpu.memory_space<vmem>>, vector<1x4x1xf32>
    %3 = vector.shape_cast %2 : vector<1x4x1xf32> to vector<4x1xf32>
    %c2 = arith.constant 2 : index
    %c0_4 = arith.constant 0 : index
    %c0_5 = arith.constant 0 : index
    %4 = vector.load %arg2[%c2, %c0_4, %c0_5] : memref<3x4x1xf32, #tpu.memory_space<vmem>>, vector<1x4x1xf32>
    %5 = vector.shape_cast %4 : vector<1x4x1xf32> to vector<4x1xf32>
    %c0_6 = arith.constant 0 : index
    %c0_7 = arith.constant 0 : index
    %c0_8 = arith.constant 0 : index
    %c0_9 = arith.constant 0 : index
    %6 = vector.load %arg3[%c0_6, %c0_7, %c0_8, %c0_9] : memref<2x1x4x256xf32, #tpu.memory_space<vmem>>, vector<2x1x4x256xf32>
    %cst = arith.constant dense<0.000000e+00> : vector<2x1x4xf32>
    %7 = vector.multi_reduction <add>, %6, %cst [3] : vector<2x1x4x256xf32> to vector<2x1x4xf32>
    %8 = vector.shape_cast %7 : vector<2x1x4xf32> to vector<2x1x4x1xf32>
    %9 = arith.mulf %6, %6 : vector<2x1x4x256xf32>
    %cst_10 = arith.constant dense<0.000000e+00> : vector<2x1x4xf32>
    %10 = vector.multi_reduction <add>, %9, %cst_10 [3] : vector<2x1x4x256xf32> to vector<2x1x4xf32>
    %11 = vector.shape_cast %10 : vector<2x1x4xf32> to vector<2x1x4x1xf32>
    %cst_11 = arith.constant 3.906250e-03 : f32
    %12 = vector.broadcast %cst_11 : f32 to vector<2x1x4x1xf32>
    %13 = arith.mulf %8, %12 : vector<2x1x4x1xf32>
    %cst_12 = arith.constant 3.906250e-03 : f32
    %14 = vector.broadcast %cst_12 : f32 to vector<2x1x4x1xf32>
    %15 = arith.mulf %11, %14 : vector<2x1x4x1xf32>
    %16 = arith.mulf %13, %13 : vector<2x1x4x1xf32>
    %17 = arith.subf %15, %16 : vector<2x1x4x1xf32>
    %cst_13 = arith.constant 0.000000e+00 : f32
    %18 = vector.broadcast %cst_13 : f32 to vector<2x1x4x1xf32>
    %19 = arith.maximumf %17, %18 : vector<2x1x4x1xf32>
    %cst_14 = arith.constant 9.99999974E-6 : f32
    %20 = vector.broadcast %cst_14 : f32 to vector<2x1x4x1xf32>
    %21 = arith.addf %19, %20 : vector<2x1x4x1xf32>
    %22 = math.rsqrt %21 : vector<2x1x4x1xf32>
    %23 = vector.shape_cast %1 : vector<4x1xf32> to vector<1x1x4x1xf32>
    %24 = vector.broadcast %23 : vector<1x1x4x1xf32> to vector<2x1x4x1xf32>
    %25 = arith.mulf %24, %22 : vector<2x1x4x1xf32>
    %26 = vector.shape_cast %3 : vector<4x1xf32> to vector<1x1x4x1xf32>
    %27 = vector.broadcast %26 : vector<1x1x4x1xf32> to vector<2x1x4x1xf32>
    %28 = arith.subf %27, %25 : vector<2x1x4x1xf32>
    %29 = arith.mulf %28, %13 : vector<2x1x4x1xf32>
    %30 = vector.shape_cast %5 : vector<4x1xf32> to vector<1x1x4x1xf32>
    %31 = vector.broadcast %30 : vector<1x1x4x1xf32> to vector<2x1x4x1xf32>
    %32 = arith.addf %29, %31 : vector<2x1x4x1xf32>
    %33 = vector.broadcast %25 : vector<2x1x4x1xf32> to vector<2x1x4x256xf32>
    %34 = arith.mulf %6, %33 : vector<2x1x4x256xf32>
    %35 = vector.broadcast %32 : vector<2x1x4x1xf32> to vector<2x1x4x256xf32>
    %36 = arith.addf %34, %35 : vector<2x1x4x256xf32>
    %37 = arith.negf %36 : vector<2x1x4x256xf32>
    %38 = math.exp %37 : vector<2x1x4x256xf32>
    %cst_15 = arith.constant 1.000000e+00 : f32
    %39 = vector.broadcast %cst_15 : f32 to vector<2x1x4x256xf32>
    %40 = arith.addf %39, %38 : vector<2x1x4x256xf32>
    %41 = arith.divf %39, %40 : vector<2x1x4x256xf32>
    %42 = arith.mulf %6, %41 : vector<2x1x4x256xf32>
    %43 = vector.extract_strided_slice %42 {offsets = [0, 0, 0, 0], sizes = [1, 1, 4, 256], strides = [1, 1, 1, 1]} : vector<2x1x4x256xf32> to vector<1x1x4x256xf32>
    %44 = vector.shape_cast %43 : vector<1x1x4x256xf32> to vector<1x4x256xf32>
    %c0_16 = arith.constant 0 : index
    %c0_17 = arith.constant 0 : index
    %c0_18 = arith.constant 0 : index
    %45 = vector.load %arg4[%c0_16, %c0_17, %c0_18] : memref<1x4x512xf32, #tpu.memory_space<vmem>>, vector<1x4x256xf32>
    tpu.vector_store %arg4[%c0_16, %c0_17, %c0_18], %44 {strides = array<i32>} : memref<1x4x512xf32, #tpu.memory_space<vmem>>, vector<1x4x256xf32>,
    %46 = vector.extract_strided_slice %42 {offsets = [1, 0, 0, 0], sizes = [1, 1, 4, 256], strides = [1, 1, 1, 1]} : vector<2x1x4x256xf32> to vector<1x1x4x256xf32>
    %47 = vector.shape_cast %46 : vector<1x1x4x256xf32> to vector<1x4x256xf32>
    %c0_19 = arith.constant 0 : index
    %c0_20 = arith.constant 0 : index
    %c256 = arith.constant 256 : index
    %48 = vector.load %arg4[%c0_19, %c0_20, %c256] : memref<1x4x512xf32, #tpu.memory_space<vmem>>, vector<1x4x256xf32>
    tpu.vector_store %arg4[%c0_19, %c0_20, %c256], %47 {strides = array<i32>} : memref<1x4x512xf32, #tpu.memory_space<vmem>>, vector<1x4x256xf32>,
    return
  }
  func.func @transform_0(%arg0: i32, %arg1: i32) -> (i32, i32, i32) {
    %c0_i32 = arith.constant 0 : i32
    %c0_i32_0 = arith.constant 0 : i32
    %c0_i32_1 = arith.constant 0 : i32
    %c0_i32_2 = arith.constant 0 : i32
    return %c0_i32, %c0_i32_0, %c0_i32_1 : i32, i32, i32
  }
  func.func @transform_1(%arg0: i32, %arg1: i32) -> (i32, i32, i32, i32) {
    %c0_i32 = arith.constant 0 : i32
    %c0_i32_0 = arith.constant 0 : i32
    %c0_i32_1 = arith.constant 0 : i32
    return %arg0, %arg1, %c0_i32, %c0_i32_0 : i32, i32, i32, i32
  }
  func.func @transform_2(%arg0: i32, %arg1: i32) -> (i32, i32, i32) {
    %c2_i32 = arith.constant 2 : i32
    %0 = arith.muli %arg0, %c2_i32 : i32
    %1 = arith.addi %0, %arg1 : i32
    %c0_i32 = arith.constant 0 : i32
    %c0_i32_0 = arith.constant 0 : i32
    %c0_i32_1 = arith.constant 0 : i32
    return %1, %c0_i32, %c0_i32_0 : i32, i32, i32
  }
}

</mosaic_0001>

<bundles_post_ra>
// kernel: tpu_custom_call.1
= control target key start
LH: loop header
LB: loop body
LE: loop exit
PB: predicated region body
PF: predicated region fallthrough
CT: control target
= control target key end

     0   :  { %7 = vsyncpa [#allocation3], 0  ;;  %s1009_s0 = inlined_call_operand.vmem [shape: f32[3,4,1], index: 0, kind: input, shape index: {}]   ;;  %s1010_s1 = inlined_call_operand.hbm [shape: f32[4,2,4,256], index: 1, kind: input, shape index: {}]   ;;  %s1011_s2 = inlined_call_operand.hbm [shape: f32[4,4,512], index: 2, kind: output, shape index: {}]  }
   0x1   :  { %9 = vsyncpa [#allocation3 + $0x1], 0 }
   0x2   :  { %10 = vsyncpa [#allocation4], 0 }
   0x3   :  { %12 = vsyncpa [#allocation4 + $0x1], 0  ;;  %s746_s9 = smov 0   ;;  %s748_s10 = smov 0  }
   0x4   :  { %s750_s11 = smov 0   ;;  %s752_s12 = smov 0  }
   0x5   :  { %s754_s13 = smov 0   ;;  %s756_s14 = smov 0  }
   0x6   :  { %s758_s15 = smov 0   ;;  %s760_s16 = smov 0  }
   0x7   :  { %s762_s17 = smov 0   ;;  %s764_s18 = smov 0  }
   0x8   :  { %s766_s19 = smov 0  }
   0x9 LB: > { %s421_s20 = sadd.s32 4294967295, %s722_s19   ;;  %s422_s21 = sadd.s32 4294967294, %s722_s19   ;;  %s722_s19 = sphi %s766_s19, %s18_s19   ;;  %s718_s18 = sphi %s764_s18, %s1035_s18   ;;  %s714_s17 = sphi %s762_s17, %s1034_s17   ;;  %s710_s16 = sphi %s760_s16, %s1033_s16   ;;  %s706_s15 = sphi %s758_s15, %s1032_s15   ;;  %s702_s14 = sphi %s756_s14, %s1031_s14   ;;  %s698_s13 = sphi %s754_s13, %s1030_s13   ;;  %s694_s12 = sphi %s752_s12, %s1029_s12   ;;  %s690_s11 = sphi %s750_s11, %s1028_s11   ;;  %s686_s10 = sphi %s748_s10, %s1027_s10   ;;  %s682_s9 = sphi %s746_s9, %s1026_s9  }
   0xa   : > { %s27_s22 = sadd.s32 1, %s714_s17  ;;  %s30_s23 = sadd.s32 1, %s718_s18 }
   0xb   : > { %p28_p0 = scmp.ge.s32.totalorder %s27_s22, 2  ;;  %s60_s24 = sadd.s32 1, %s702_s14 }
   0xc   : > { %p67_p1 = scmp.ne.s32.totalorder %s702_s14, %s698_s13  ;;  %p68_p2 = scmp.eq.s32.totalorder %s722_s19, 0 }
   0xd   : > { %s1037_s22 = smov (%p28_p0, %s27_s22), 0  ;;  %s1039_s23 = smov (!%p28_p0, %s30_s23), %s718_s18 }
   0xe   : > { %1015 = sst [smem:[#allocation8_spill]] %s1037_s22  ;;  %s56_s25 = ssub.s32 %s714_s17, %s1037_s22 }
   0xf   : > { %p812_p3 = por %p68_p2, %p67_p1  ;;  %p32_p4 = scmp.ge.s32.totalorder %s1039_s23, 2 }
  0x10   : > { %p73_p5 = scmp.ne.s32.totalorder %s698_s13, %s694_s12  ;;  %p74_p6 = scmp.eq.s32.totalorder %s421_s20, 0 }
  0x11   : > { %s423_s27 = sshll.u32 %s718_s18, 1  ;;  %s1041_s23 = smov (%p32_p4, %s1039_s23), 0 }
  0x12   : > { %1017 = sst [smem:[#allocation9_spill]] %s1041_s23  ;;  %p822_p7 = por %p74_p6, %p73_p5 }
  0x13   : > { %s84_s29 = sadd.s32 %s714_s17, %s423_s27  ;;  %s55_s30 = ssub.s32 %s718_s18, %s1041_s23 }
  0x14   : > { %s424_s3 = sshll.u32 %s1041_s23, 1  ;;  %s57_s4 = sor.u32 %s56_s25, %s55_s30 }
  0x15   : > { %s86_s5 = sadd.s32 %s424_s3, %s1037_s22  ;;  %p58_p8 = scmp.eq.s32.totalorder %s57_s4, 0 }
  0x16   : > { %s87_s6 = ssub.s32 %s84_s29, %s86_s5  ;;  %s90_s7 = sadd.s32 1, %s690_s11 }
  0x17   : > { %p88_p9 = scmp.eq.s32.totalorder %s87_s6, 0  ;;  %p100_p10 = scmp.ne.s32.totalorder %s690_s11, %s686_s10 }
  0x18   : > { %s833_s8 = scalar_select %p58_p8, %s702_s14, %s60_s24  }
  0x19   : > { %s836_s12 = scalar_select %p88_p9, %s690_s11, %s90_s7  }
  0x1a   : > { %p101_p11 = scmp.eq.s32.totalorder %s421_s20, 3  ;;  %p106_p12 = scmp.ne.s32.totalorder %s686_s10, %s682_s9 }
  0x1b   : > { %p107_p13 = scmp.eq.s32.totalorder %s422_s21, 3  ;;  %p459_p2 = scmp.lt.s32.totalorder %s722_s19, 4 }
  0x1c   : > { %p846_p0 = por %p101_p11, %p100_p10  ;;  %s130_s24 = sand.u32 1, %s702_s14  }
  0x1d   : > { %p850_p1 = por %p107_p13, %p106_p12  ;;  %s429_s29 = sshll.u32 %s714_s17, 1 }
  0x1e   : > { %s1019_s25 = scalar_select %p846_p0, 1, 0 }
  0x1f   : > { %s1020_s27 = scalar_select %p850_p1, 1, 0 }
  0x20   : > { %s427_s30 = sshll.u32 %s130_s24, 4  ;;  %s445_s3 = sshll.u32 %s718_s18, 3 }
  0x21   : > { %s141_s4 = sadd.s32 %s445_s3, %s429_s29  ;;  %s134_s5 = scalar_lea.vmem [#allocation2], %s427_s30 }
  0x22   : > { %s144_s20 = sshll.u32 %s134_s5, 4  ;;  %s431_s6 = sshll.u32 %s141_s4, 6  ;;  %s858_s20 = int_to_ptr.vmem [resolvable:$true] %s144_s20 }
  0x23   : > { %s863_s23 = scalar_lea.hbm %s1010_s1, %s431_s6  ;;  %p867_p4 = pnand %p459_p2, %p812_p3 }
  0x24   : > { %s871_s29 = scalar_lea.sflag [#allocation3], %s130_s24  ;;  %s570_s30 = scalar_lea.hbm %s863_s23, 256 }
  0x25   : > { %p571_p5 = scmp.ne.s32.totalorder %s863_s23, %s570_s30  ;;  %p572_p6 = pneg %p867_p4 }
  0x26   : > { %s575_s4 = scalar_lea.hbm %s1010_s1, 1024  ;;  %p576_p3 = scmp.lt.u32.totalorder %s863_s23, %s1010_s1 }
  0x27   : > { %p573_p8 = pnand %p572_p6, %p571_p5  ;;  %p577_p10 = scmp.lt.u32.totalorder %s575_s4, %s570_s30 }
  0x28   : > { %p579_p12 = scmp.lt.u32.totalorder %s570_s30, %s863_s23 }
  0x29   : > { %p574_p9 = pneg %p573_p8  ;;  %p578_p11 = por %p577_p10, %p576_p3 }
  0x2b   : > { %p580_p13 = por %p579_p12, %p578_p11 }
  0x2d   : > { %p581_p2 = pnand %p580_p13, %p574_p9 }
  0x2f   : > { %584 = shalt.err (!%p581_p2)
}
  0x30   : > { %s585_s24 = scalar_lea.vmem %s858_s20, 256  ;;  %s724_s21 = smov [#allocation2]  }
  0x31   : > { %p586_p5 = scmp.ne.s32.totalorder %s858_s20, %s585_s24  ;;  %s590_s7 = sshll.u32 %s724_s21, 4  ;;  %s591_s7 = int_to_ptr.vmem [resolvable:$false] %s590_s7 }
  0x32   : > { %s592_s26 = scalar_lea.vmem %s591_s7, 512  ;;  %p593_p0 = scmp.lt.s32.totalorder %s858_s20, %s591_s7 }
  0x33   : > { %p588_p8 = pnand %p586_p5, %p572_p6  ;;  %p594_p3 = scmp.lt.s32.totalorder %s592_s26, %s585_s24 }
  0x35   : > { %p589_p1 = pneg %p588_p8  ;;  %p595_p10 = por %p594_p3, %p593_p0 }
  0x37   : > { %p596_p11 = pnand %p595_p10, %p589_p1 }
  0x39   : > { %599 = shalt.err (!%p596_p11)
}
  0x3a   : > { %s725_s30 = smov 256   ;;  %s726_s3 = smov 128  }
  0x3b   : > { %s727_s4 = smov 8   ;;  %p432_p6 = scmp.ge.s32.totalorder %s722_s19, 1 }
  0x3c   : > { %454 = dma.hbm_to_vmem [thread:$0]  (!%p867_p4), %s863_s23, 256, %s858_s20, %s871_s29, %s725_s30, %s726_s3, %s727_s4  }
  0x3d   : > { %p152_p9 = scmp.lt.s32.totalorder %s722_s19, 5 }
  0x3f   : > { %p153_p12 = pnand %p432_p6, %p152_p9 }
  0x40   : > { %s158_s5 = sand.u32 (!%p153_p12), 1, %s698_s13  }
  0x41   : > { %156 = sbr.rel (%p153_p12) target bundleno = 430 (0x1ae), region = 28  ;;  %s433_s6 = sshll.u32 (!%p153_p12), %s158_s5, 4 }
  0x42   : > { %s159_s24 = scalar_lea.sflag (!%p153_p12), [#allocation3], %s158_s5  ;;  %s162_s21 = scalar_lea.vmem (!%p153_p12), [#allocation2], %s433_s6 }
  0x48   : > { %673 = dma.done.wait (%p822_p7), %s159_s24, 256  }
  0x49   : > { %675 = vsyncadd (%p822_p7), %s159_s24, 4294967040  ;;  %vm199_vm0 = vcmask 1043456   ;;  %v906_v0 = vld [vmem:[%s162_s21] sm:$0xff]  ;;  %v908_v1 = vld [vmem:[%s162_s21 + $0x8] sm:$0xff]  ;;  %v728_v20 = vmov 0   ;;  %v261_v52 = vlaneseq  ;;  %s180_s26 = sand.u32 1, %s686_s10  }
  0x4a   : > { %v195_v2 = vcombine.high %v906_v0, %v906_v0  ;;  %v200_v3 = vsel %vm199_vm0, %v906_v0, 0.0  ;;  %v210_v4 = vmul.f32 %v906_v0, %v906_v0  ;;  %v196_v5 = vcombine.high %v908_v1, %v908_v1  ;;  %554 = vset.pattern.permute.xlu0 %v728_v20  ;;  %555 = vset.pattern.permute.xlu1 %v728_v20  ;;  %v186_v37 = vld [vmem:[%s1009_s0] sm:$0xf]  ;;  %v435_v39 = vld [vmem:[%s1009_s0 + $0x4] sm:$0xf]  ;;  %s440_s30 = sshll.u32 %s710_s16, 1 }
  0x4b   : > { %v205_v6 = vsel %vm199_vm0, %v908_v1, 0.0  ;;  %v211_v7 = vmul.f32 %v908_v1, %v908_v1  ;;  %v436_v45 = vld [vmem:[%s1009_s0 + $0x8] sm:$0xf]  ;;  %v729_v50 = vmov 839922192   ;;  %v262_v54 = vshrl.u32 %v261_v52, 7  ;;  %s327_s4 = sadd.s32 %s706_s15, %s440_s30 }
  0x4c   : > { %v201_v8 = vsel %vm199_vm0, %v195_v2, 0.0  ;;  %v214_v9 = vcombine.high %v210_v4, %v210_v4  ;;  %v218_v10 = vsel %vm199_vm0, %v210_v4, 0.0  ;;  %v206_v11 = vsel %vm199_vm0, %v196_v5, 0.0  ;;  %s434_s3 = sshll.u32 %s180_s26, 4  ;;  %s446_s5 = sshll.u32 %s327_s4, 8 }
  0x4d   : > { %v202_v12 = vadd.f32 %v201_v8, %v200_v3  ;;  %v215_v13 = vcombine.high %v211_v7, %v211_v7  ;;  %v223_v15 = vsel %vm199_vm0, %v211_v7, 0.0  ;;  %v207_v17 = vadd.f32 %v206_v11, %v205_v6  ;;  %s182_s6 = scalar_lea.vmem [#allocation5], %s434_s3  ;;  %s947_s23 = scalar_lea.hbm %s1011_s2, %s446_s5 }
  0x4e   : > { %v219_v14 = vsel %vm199_vm0, %v214_v9, 0.0  ;;  %v259_v51 = vunpack.c.l.s4 %v729_v50  ;;  %s335_s24 = sshll.u32 %s182_s6, 4  ;;  %s319_s15 = scalar_lea.sflag [#allocation4], %s180_s26  ;;  %s949_s24 = int_to_ptr.vmem [resolvable:$true] %s335_s24 }
  0x4f   : > { %203 = vadd.xlane.f32.xlu0 %v202_v12  ;;  %v220_v16 = vadd.f32 %v219_v14, %v218_v10  ;;  %v224_v18 = vsel %vm199_vm0, %v215_v13, 0.0  ;;  %s600_s16 = scalar_lea.vmem %s949_s24, 256  ;;  %p1022_p0 = scmp.ne.s32.totalorder %s1019_s25, 0 }
  0x50   : > { %v225_v19 = vadd.f32 %v224_v18, %v223_v15  ;;  %v260_v53 = vunpack.c.0.s8 %v259_v51  ;;  %p601_p7 = scmp.ne.s32.totalorder %s949_s24, %s600_s16  ;;  %s730_s28 = smov [#allocation5]  }
  0x51   : > { %221 = vadd.xlane.f32.xlu1 %v220_v16  ;;  %s604_s20 = sshll.u32 %s730_s28, 4  ;;  %s605_s20 = int_to_ptr.vmem [resolvable:$false] %s604_s20 }
  0x52   : > { %v263_v55 = vsub.s32 %v260_v53, %v262_v54  ;;  %p602_p1 = pnand %p601_p7, %p1022_p0  ;;  %s606_s29 = scalar_lea.vmem %s605_s20, 512 }
  0x53   : > { %208 = vadd.xlane.f32.xlu0 %v207_v17  ;;  %p607_p13 = scmp.lt.s32.totalorder %s949_s24, %s605_s20  ;;  %p608_p2 = scmp.lt.s32.totalorder %s606_s29, %s600_s16 }
  0x54   : > { %p603_p4 = pneg %p602_p1 }
  0x55   : > { %226 = vadd.xlane.f32.xlu1 %v225_v19  ;;  %p609_p5 = por %p608_p2, %p607_p13 }
  0x57   : > { %p610_p8 = pnand %p609_p5, %p603_p4 }
  0xdc   : > { %v204_v21 = vpop.xlane.xlu0 %203 }
  0xdd   : > { %v228_v22 = vmul.f32 0.00390625, %v204_v21 }
  0xde   : > { %v222_v23 = vpop.xlane.xlu1 %221 }
  0xdf   : > { %v232_v24 = vmul.f32 %v228_v22, %v228_v22  ;;  %v230_v25 = vmul.f32 0.00390625, %v222_v23 }
  0xe0   : > { %v209_v26 = vpop.xlane.xlu0 %208 }
  0xe1   : > { %v234_v27 = vsub.f32 %v230_v25, %v232_v24  ;;  %v229_v28 = vmul.f32 0.00390625, %v209_v26 }
  0xe2   : > { %v227_v29 = vpop.xlane.xlu1 %226 }
  0xe3   : > { %v236_v30 = vmax.f32 %v234_v27, 0.0  ;;  %v233_v31 = vmul.f32 %v229_v28, %v229_v28  ;;  %v231_v32 = vmul.f32 0.00390625, %v227_v29 }
  0xe5   : > { %v238_v33 = vadd.f32 1e-05, %v236_v30  ;;  %v235_v34 = vsub.f32 %v231_v32, %v233_v31 }
  0xe7   : > { %558 = vrsqrt.f32 %v238_v33  ;;  %v237_v35 = vmax.f32 %v235_v34, 0.0 }
  0xe9   : > { %v239_v36 = vadd.f32 1e-05, %v237_v35 }
  0xeb   : > { %560 = vrsqrt.f32 %v239_v36 }
  0xf1   : > { %v559_v38 = vpop.eup %558 }
  0xf2   : > { %v242_v40 = vmul.f32 %v559_v38, %v186_v37 }
  0xf4   : > { %252 = vperm.xlu0 %554, %v242_v40   ;;  %v244_v41 = vsub.f32 %v435_v39, %v242_v40 }
  0xf5   : > { %v561_v42 = vpop.eup %560 }
  0xf6   : > { %v243_v43 = vmul.f32 %v561_v42, %v186_v37  ;;  %v246_v44 = vmul.f32 %v244_v41, %v228_v22 }
  0xf8   : > { %256 = vperm.xlu1 %555, %v243_v43   ;;  %v245_v46 = vsub.f32 %v435_v39, %v243_v43  ;;  %v248_v47 = vadd.f32 %v436_v45, %v246_v44 }
  0xfa   : > { %v247_v48 = vmul.f32 %v245_v46, %v229_v28 }
  0xfc   : > { %278 = vperm.xlu1 %555, %v248_v47   ;;  %v249_v49 = vadd.f32 %v436_v45, %v247_v48 }
 0x100   : > { %282 = vperm.xlu1 %555, %v249_v49  }
 0x173   : > { %v253_v56 = vpop.permute.xlu0 %252 }
 0x174   : > { %v264_v58 = vrot.slane %v253_v56, %v263_v55 }
 0x176   : > { %v274_v60 = vmul.f32 %v264_v58, %v906_v0 }
 0x177   : > { %v257_v57 = vpop.permute.xlu1 %256 }
 0x178   : > { %v271_v61 = vrot.slane %v257_v57, %v263_v55 }
 0x17a   : > { %v275_v3 = vmul.f32 %v271_v61, %v908_v1 }
 0x17b   : > { %v279_v59 = vpop.permute.xlu1 %278 }
 0x17c   : > { %v290_v62 = vrot.slane %v279_v59, %v263_v55 }
 0x17e   : > { %v300_v63 = vadd.f32 %v290_v62, %v274_v60 }
 0x17f   : > { %v283_v2 = vpop.permute.xlu1 %282 }
 0x180   : > { %v437_v4 = vmul.f32 -1.442695, %v300_v63  ;;  %v297_v5 = vrot.slane %v283_v2, %v263_v55 }
 0x182   : > { %562 = vpow2.f32 %v437_v4  ;;  %v301_v6 = vadd.f32 %v297_v5, %v275_v3 }
 0x184   : > { %v438_v7 = vmul.f32 -1.442695, %v301_v6 }
 0x186   : > { %564 = vpow2.f32 %v438_v7 }
 0x18c   : > { %v563_v8 = vpop.eup %562 }
 0x18d   : > { %v308_v9 = vadd.f32 1.0, %v563_v8 }
 0x18f   : > { %566 = vrcp.f32 %v308_v9 }
 0x190   : > { %v565_v10 = vpop.eup %564 }
 0x191   : > { %v309_v11 = vadd.f32 1.0, %v565_v10 }
 0x193   : > { %568 = vrcp.f32 %v309_v11 }
 0x199   : > { %v567_v12 = vpop.eup %566 }
 0x19a   : > { %v314_v13 = vmul.f32 %v567_v12, %v906_v0 }
 0x19c   : > { %316 = vst [vmem:[%s182_s6] sm:$0xff] %v314_v13 }
 0x19d   : > { %v569_v14 = vpop.eup %568 }
 0x19e   : > { %v315_v15 = vmul.f32 %v569_v14, %v908_v1 }
 0x1a0   : > { %317 = vst [vmem:[%s182_s6 + $0x8] sm:$0xff] %v315_v15 }
 0x1a1   : > { %613 = shalt.err (!%p610_p8)
}
 0x1a2   : > { %s614_s7 = scalar_lea.hbm %s947_s23, 256  ;;  %s618_s3 = scalar_lea.hbm %s1011_s2, 1024 }
 0x1a3   : > { %p615_p3 = scmp.ne.s32.totalorder %s947_s23, %s614_s7  ;;  %p619_p6 = scmp.lt.u32.totalorder %s947_s23, %s1011_s2 }
 0x1a4   : > { %p620_p9 = scmp.lt.u32.totalorder %s618_s3, %s614_s7  ;;  %p622_p7 = scmp.lt.u32.totalorder %s614_s7, %s947_s23 }
 0x1a5   : > { %p616_p10 = pnand %p615_p3, %p1022_p0 }
 0x1a6   : > { %p621_p12 = por %p620_p9, %p619_p6 }
 0x1a7   : > { %p617_p11 = pneg %p616_p10 }
 0x1a8   : > { %p623_p1 = por %p622_p7, %p621_p12 }
 0x1aa   : > { %p624_p4 = pnand %p623_p1, %p617_p11 }
 0x1ac   : > { %627 = shalt.err (!%p624_p4)
}
 0x1ad   : > { %449 = dma.vmem_to_hbm [thread:$0]  (%p1022_p0), %s949_s24, 256, %s947_s23, %s319_s15  }
 0x1ae PF: > { %p460_p13 = scmp.ge.s32.totalorder %s722_s19, 2  ;;  %s347_s6 = sand.u32 1, %s682_s9  }
 0x1af   : > { %p1023_p2 = scmp.ne.s32.totalorder %s1020_s27, 0  ;;  %s348_s21 = scalar_lea.sflag [#allocation4], %s347_s6 }
 0x1b1   : > { %p456_p5 = pnand %p460_p13, %p1023_p2 }
 0x1b3   : > { %677 = dma.done.wait (!%p456_p5), %s348_s21, 256  }
 0x1b4   : > { %679 = vsyncadd (!%p456_p5), %s348_s21, 4294967040  ;;  %s18_s19 = sadd.s32 1, %s722_s19   ;;  %s1024_s25 = sld [smem:[#allocation8_spill]] }
 0x1b5   : > { %p15_p8 = scmp.ge.s32.totalorder %s18_s19, 6   ;;  %s1025_s24 = sld [smem:[#allocation9_spill]] }
 0x1b6   : > { %s1026_s9 = smov %s686_s10  ;;  %s1027_s10 = smov %s690_s11 }
 0x1b7   : > { %s1028_s11 = smov %s836_s12  ;;  %s1029_s12 = smov %s698_s13 }
 0x1b8   : > { %s1030_s13 = smov %s702_s14  ;;  %s1031_s14 = smov %s833_s8 }
 0x1b9   : > { %s1032_s15 = smov %s714_s17  ;;  %s1033_s16 = smov %s718_s18 }
 0x1ba   : > { %s1034_s17 = smov %s1024_s25  ;;  %17 = sbr.rel (!%p15_p8) target bundleno = 9 (0x9), region = 75 }
 0x1bb   : > { %s1035_s18 = smov %s1025_s24 }
 0x1c1   :  { %353 = vsyncpa [#allocation3], 1 }
 0x1c2   :  { %355 = vsyncpa [#allocation3 + $0x1], 1 }
 0x1c3   :  { %356 = vsyncpa [#allocation4], 1 }
 0x1c4   :  { %358 = vsyncpa [#allocation4 + $0x1], 1 }

</bundles_post_ra>
